<compile_context>
chip_gen: v7x
topology: tpu7x:2x2x1
jax: 0.10.0
libtpu: 0.0.40
codegen_flags: <defaults>
</compile_context>

<pallas_src>
import functools
import math

import numpy as np
import jax
import jax.numpy as jnp
from jax.experimental import pallas as pl
from jax.experimental.pallas import tpu as pltpu

_LANES = 128


def build_pe_table(d_model: int, max_seq_len: int) -> np.ndarray:
    """Vectorized, numerically identical to the PyTorch __init__ double loop."""
    assert d_model % 2 == 0, "original module writes pe[pos, i+1]; d_model must be even"
    pos = np.arange(max_seq_len, dtype=np.float64)[:, None]          # [L, 1]
    i = np.arange(0, d_model, 2, dtype=np.float64)[None, :]          # [1, D/2]
    pe = np.zeros((max_seq_len, d_model), dtype=np.float32)
    # Reproduces the module's (non-canonical) exponents exactly:
    #   sin(pos / 10000 ** (2*i/d_model)),  cos(pos / 10000 ** (2*(i+1)/d_model))
    pe[:, 0::2] = np.sin(pos / np.power(10000.0, 2.0 * i / d_model))
    pe[:, 1::2] = np.cos(pos / np.power(10000.0, 2.0 * (i + 1.0) / d_model))
    return pe[None, :, :]  # [1, max_seq_len, d_model]


def init_positional_encoder(d_model, max_seq_len=1000, dtype=jnp.float32):
    """One-time setup (== module __init__): build + pre-fold the PE table."""
    pe = jnp.asarray(build_pe_table(d_model, max_seq_len), dtype=dtype)  # [1, L, D]
    total = max_seq_len * d_model
    pe_folded = None
    if total % _LANES == 0:
        # Lane-dense fold; row-major, so the first S*D/128 rows == pe[:, :S].
        pe_folded = pe.reshape(1, total // _LANES, _LANES)
    return {"d_model": d_model, "max_seq_len": max_seq_len,
            "pe": pe, "pe_folded": pe_folded}


def _target_block_bytes() -> int:
    """Generation-tuned block bytes: v5e/v6e (128 MiB VMEM) -> 8 MiB,
    v7x (64 MiB VMEM) or unknown -> 4 MiB."""
    try:
        vmem = pltpu.get_tpu_info().vmem_capacity_bytes
    except Exception:
        vmem = None
    if vmem is not None and vmem >= 96 * 1024 * 1024:
        return 8 * 1024 * 1024
    return 4 * 1024 * 1024


def _pe_kernel(x_ref, pe_ref, o_ref, *, scale):
    # x_ref / o_ref: (b_tile, tile_rows, 128) block covering b_tile batch elems.
    # pe_ref:        (1, tile_rows, 128) positional slab, broadcast over batch.
    o_ref[...] = (x_ref[...] * scale + pe_ref[...]).astype(o_ref.dtype)


def positional_encoder(x: jax.Array, params, *, donate_x: bool = False) -> jax.Array:
    """x: [B, S, D]. Returns x * sqrt(d_model) + pe[:, :S]."""
    B, S, D = x.shape
    d_model = params["d_model"]
    assert D == d_model
    assert S <= params["max_seq_len"]

    scale = math.sqrt(d_model)
    itemsize = jnp.dtype(x.dtype).itemsize
    N = S * D
    pad = 0

    # ---- Present lane-dense [B, R, 128] x and [1, >=R, 128] pe. -------------
    if N % _LANES == 0:
        R = N // _LANES
        x_in = x.reshape(B, R, _LANES)
        pe_folded = params["pe_folded"]
        if pe_folded is not None and pe_folded.dtype == x.dtype and R % 8 == 0:
            # Zero per-call table prep: pass the full pre-folded table, the
            # BlockSpec only ever indexes its first R rows (identical fold).
            pe_in = pe_folded
        else:
            # Tiny per-call slice/cast (only if R is not sublane-aligned or
            # the dtype differs from the prebuilt table).
            pe_in = params["pe"][:, :S, :].astype(x.dtype).reshape(1, R, _LANES)
    else:
        # Zero-pad the flattened activations up to a lane multiple instead of
        # masked partial stores; pad is sliced off the output below.
        N_pad = pl.cdiv(N, _LANES) * _LANES
        pad = N_pad - N
        R = N_pad // _LANES
        x_in = jnp.pad(x.reshape(B, N), ((0, 0), (0, pad))).reshape(B, R, _LANES)
        pe_flat = params["pe"][:, :S, :].astype(x.dtype).reshape(1, N)
        pe_in = jnp.pad(pe_flat, ((0, 0), (0, pad))).reshape(1, R, _LANES)

    # ---- Tiling. -------------------------------------------------------------
    target = _target_block_bytes()
    sublane = max(8, (8 * 4) // itemsize)            # f32: 8, bf16: 16, int8: 32
    row_bytes = _LANES * itemsize
    per_batch_bytes = R * row_bytes

    if per_batch_bytes >= target:
        # One batch element per block, tile over rows in ~target-sized chunks.
        b_tile = 1
        tile_rows = max(sublane, ((target // row_bytes) // sublane) * sublane)
        tile_rows = min(tile_rows, R)
    else:
        # A whole batch element is small: fold several batches into one block
        # to amortize the per-grid-step overhead.
        tile_rows = R
        b_tile = int(min(B, max(1, target // max(per_batch_bytes, 1))))

    # Row-tile axis OUTER, batch INNER: pe's block index is constant across the
    # inner (batch) steps, so its DMA is skipped across consecutive batch steps.
    grid = (pl.cdiv(R, tile_rows), pl.cdiv(B, b_tile))

    x_block = (b_tile, tile_rows, _LANES)
    pe_block = (1, tile_rows, _LANES)

    x_block_bytes = b_tile * tile_rows * row_bytes
    pe_block_bytes = tile_rows * row_bytes
    # x + out double-buffered, pe double-buffered, plus slack.  Explicit so the
    # scoped-VMEM default (16 MiB v5e / 32 MiB v6e-v7x) never de-pipelines us.
    vmem_bytes = int(4 * x_block_bytes + 2 * pe_block_bytes + (2 << 20))
    vmem_bytes = max(vmem_bytes, 16 * 1024 * 1024)

    cost = pl.CostEstimate(
        flops=2 * B * S * D,
        transcendentals=0,
        bytes_accessed=itemsize * (2 * B * R * _LANES + R * _LANES),
    )

    out = pl.pallas_call(
        functools.partial(_pe_kernel, scale=scale),
        out_shape=jax.ShapeDtypeStruct(x_in.shape, x.dtype),
        grid_spec=pltpu.PrefetchScalarGridSpec(
            num_scalar_prefetch=0,
            grid=grid,
            in_specs=[
                pl.BlockSpec(x_block, lambda t, b: (b, t, 0)),    # x: per (tile, batch)
                pl.BlockSpec(pe_block, lambda t, b: (0, t, 0)),   # pe: reused over batch
            ],
            out_specs=pl.BlockSpec(x_block, lambda t, b: (b, t, 0)),
        ),
        compiler_params=pltpu.CompilerParams(
            dimension_semantics=("parallel", "parallel"),
            vmem_limit_bytes=vmem_bytes,
        ),
        cost_estimate=cost,
        input_output_aliases={0: 0} if donate_x else {},
    )(x_in, pe_in)

    if pad:
        out = out.reshape(B, R * _LANES)[:, :N]
    return out.reshape(B, S, D)


if __name__ == "__main__":
    key = jax.random.PRNGKey(0)

    def reference(x, params):
        S = x.shape[1]
        return x * math.sqrt(params["d_model"]) + params["pe"][:, :S, :].astype(x.dtype)

    # Small shapes consistent with the module's forward: [batch, seq_len, d_model].
    # Exercises all three layout paths (batch-folded single block, pre-folded
    # full-table fast path, and the lane-padding path).
    configs = [
        (2, 8, 32, 1000),   # primary shape; per-call-sliced tiny table, batch-folded block
        (3, 16, 64, 64),    # fast path: full pre-folded table, 8-row tiles
        (2, 8, 20, 64),     # pad path: S*D not a multiple of 128
    ]
    for (B, S, D, L) in configs:
        params = init_positional_encoder(D, max_seq_len=L, dtype=jnp.float32)
        key, sub = jax.random.split(key)
        x = jax.random.normal(sub, (B, S, D), dtype=jnp.float32)
        out = jax.block_until_ready(positional_encoder(x, params))
        np.testing.assert_allclose(np.asarray(out), np.asarray(reference(x, params)),
                                   rtol=1e-6, atol=1e-6)

    print("KERNEL_OK")
</pallas_src>

<mosaic_0001>
module attributes {stable_mosaic.version = 11 : i64} {
  func.func @_pe_kernel(%arg0: i32, %arg1: i32, %arg2: memref<2x2x128xf32, #tpu.memory_space<vmem>>, %arg3: memref<1x2x128xf32, #tpu.memory_space<vmem>>, %arg4: memref<2x2x128xf32, #tpu.memory_space<vmem>>) attributes {dimension_semantics = [#tpu.dimension_semantics<parallel>, #tpu.dimension_semantics<parallel>], iteration_bounds = array<i64: 1, 1>, scalar_prefetch = 0 : i64, scratch_operands = 0 : i64, tpu.core_type = #tpu.core_type<tc>, window_params = [{transform_indices = @transform_0, window_bounds = array<i64: 2, 2, 128>}, {transform_indices = @transform_1, window_bounds = array<i64: 1, 2, 128>}, {transform_indices = @transform_2, window_bounds = array<i64: 2, 2, 128>}]} {
    %c0 = arith.constant 0 : index
    %c0_0 = arith.constant 0 : index
    %c0_1 = arith.constant 0 : index
    %0 = vector.load %arg2[%c0, %c0_0, %c0_1] : memref<2x2x128xf32, #tpu.memory_space<vmem>>, vector<2x2x128xf32>
    %cst = arith.constant 5.65685415 : f32
    %1 = vector.broadcast %cst : f32 to vector<2x2x128xf32>
    %2 = arith.mulf %0, %1 : vector<2x2x128xf32>
    %c0_2 = arith.constant 0 : index
    %c0_3 = arith.constant 0 : index
    %c0_4 = arith.constant 0 : index
    %3 = vector.load %arg3[%c0_2, %c0_3, %c0_4] : memref<1x2x128xf32, #tpu.memory_space<vmem>>, vector<1x2x128xf32>
    %4 = vector.broadcast %3 : vector<1x2x128xf32> to vector<2x2x128xf32>
    %5 = arith.addf %2, %4 : vector<2x2x128xf32>
    %c0_5 = arith.constant 0 : index
    %c0_6 = arith.constant 0 : index
    %c0_7 = arith.constant 0 : index
    %6 = vector.load %arg4[%c0_5, %c0_6, %c0_7] : memref<2x2x128xf32, #tpu.memory_space<vmem>>, vector<2x2x128xf32>
    tpu.vector_store %arg4[%c0_5, %c0_6, %c0_7], %5 {strides = array<i32>} : memref<2x2x128xf32, #tpu.memory_space<vmem>>, vector<2x2x128xf32>,
    return
  }
  func.func @transform_0(%arg0: i32, %arg1: i32) -> (i32, i32, i32) {
    %c0_i32 = arith.constant 0 : i32
    %c0_i32_0 = arith.constant 0 : i32
    return %arg1, %arg0, %c0_i32 : i32, i32, i32
  }
  func.func @transform_1(%arg0: i32, %arg1: i32) -> (i32, i32, i32) {
    %c0_i32 = arith.constant 0 : i32
    %c0_i32_0 = arith.constant 0 : i32
    %c0_i32_1 = arith.constant 0 : i32
    return %c0_i32, %arg0, %c0_i32_0 : i32, i32, i32
  }
  func.func @transform_2(%arg0: i32, %arg1: i32) -> (i32, i32, i32) {
    %c0_i32 = arith.constant 0 : i32
    %c0_i32_0 = arith.constant 0 : i32
    return %arg1, %arg0, %c0_i32 : i32, i32, i32
  }
}

</mosaic_0001>

<bundles_post_ra>
// kernel: tpu_custom_call.1
= control target key start
LH: loop header
LB: loop body
LE: loop exit
PB: predicated region body
PF: predicated region fallthrough
CT: control target
= control target key end

     0   :  { %7 = vsyncpa [#allocation3], 0  ;;  %s156_s0 = inlined_call_operand.hbm [shape: f32[2,2,128], index: 0, kind: input, shape index: {}]   ;;  %s157_s1 = inlined_call_operand.vmem [shape: f32[1,2,128], index: 1, kind: input, shape index: {}]   ;;  %s158_s2 = inlined_call_operand.hbm [shape: f32[2,2,128], index: 2, kind: output, shape index: {}]  }
   0x1   :  { %8 = vsyncpa [#allocation4], 0  ;;  %s104_s9 = smov [#allocation2]   ;;  %s56_s13 = scalar_lea.hbm %s156_s0, 64 }
   0x2   :  { %s14_s10 = sshll.u32 %s104_s9, 4  ;;  %p57_p0 = scmp.ne.s32.totalorder %s156_s0, %s56_s13  ;;  %s15_s10 = int_to_ptr.vmem [resolvable:$true] %s14_s10 }
   0x3   :  { %p60_p1 = scmp.lt.u32.totalorder %s56_s13, %s156_s0 }
   0x5   :  { %p62_p2 = pnand %p60_p1, %p57_p0 }
   0x7   :  { %65 = shalt.err (!%p62_p2)
}
   0x8   :  { %s66_s18 = scalar_lea.vmem %s15_s10, 64  ;;  %p71_p4 = scmp.lt.s32.totalorder %s15_s10, %s15_s10 }
   0x9   :  { %p67_p3 = scmp.ne.s32.totalorder %s15_s10, %s66_s18  ;;  %p72_p5 = scmp.lt.s32.totalorder %s66_s18, %s66_s18 }
   0xb   :  { %p73_p6 = por %p72_p5, %p71_p4 }
   0xd   :  { %p74_p7 = pnand %p73_p6, %p67_p3 }
   0xf   :  { %77 = shalt.err (!%p74_p7)
}
  0x10   :  { %s105_s19 = smov 32   ;;  %s106_s20 = smov 2  }
  0x11   :  { %20 = dma.hbm_to_vmem [thread:$0]  %s156_s0, 64, %s15_s10, [#allocation3], %s105_s19, %s105_s19, %s106_s20  }
  0x12   :  { %100 = dma.done.wait [#allocation3], 64  }
  0x13   :  { %101 = vsyncadd [#allocation3], 4294967232  ;;  %s107_s23 = smov [#allocation5]   ;;  %v26_v0 = vld [vmem:[#allocation2] sm:$0x3] }
  0x14   :  { %s40_s24 = sshll.u32 %s107_s23, 4  ;;  %v30_v1 = vld [vmem:[%s157_s1] sm:$0x3]  ;;  %v27_v2 = vld [vmem:[#allocation2 + $0x2] sm:$0x3]  ;;  %s41_s24 = int_to_ptr.vmem [resolvable:$true] %s40_s24 }
  0x15   :  { %v28_v3 = vmul.f32 5.656854, %v26_v0  ;;  %v29_v4 = vmul.f32 5.656854, %v27_v2  ;;  %s78_s27 = scalar_lea.vmem %s41_s24, 64  ;;  %p83_p9 = scmp.lt.s32.totalorder %s41_s24, %s41_s24 }
  0x16   :  { %p79_p8 = scmp.ne.s32.totalorder %s41_s24, %s78_s27  ;;  %p84_p10 = scmp.lt.s32.totalorder %s78_s27, %s78_s27 }
  0x17   :  { %v31_v5 = vadd.f32 %v30_v1, %v28_v3  ;;  %v32_v6 = vadd.f32 %v30_v1, %v29_v4 }
  0x18   :  { %p85_p11 = por %p84_p10, %p83_p9 }
  0x19   :  { %33 = vst [vmem:[#allocation5] sm:$0x3] %v31_v5  ;;  %34 = vst [vmem:[#allocation5 + $0x2] sm:$0x3] %v32_v6 }
  0x1a   :  { %p86_p12 = pnand %p85_p11, %p79_p8 }
  0x1c   :  { %89 = shalt.err (!%p86_p12)
}
  0x1d   :  { %s90_s29 = scalar_lea.hbm %s158_s2, 64 }
  0x1e   :  { %p91_p13 = scmp.ne.s32.totalorder %s158_s2, %s90_s29  ;;  %p94_p0 = scmp.lt.u32.totalorder %s90_s29, %s158_s2 }
  0x20   :  { %p96_p1 = pnand %p94_p0, %p91_p13 }
  0x22   :  { %99 = shalt.err (!%p96_p1)
}
  0x23   :  { %46 = dma.vmem_to_hbm [thread:$0]  %s41_s24, 64, %s158_s2, [#allocation4], %s105_s19, %s105_s19, %s106_s20  }
  0x24   :  { %102 = dma.done.wait [#allocation4], 64  }
  0x25   :  { %103 = vsyncadd [#allocation4], 4294967232 }
  0x26   :  { %50 = vsyncpa [#allocation3], 1 }
  0x27   :  { %51 = vsyncpa [#allocation4], 1 }

</bundles_post_ra>
